<compile_context>
chip_gen: v5e
topology: v5e:2x2
jax: 0.10.0
libtpu: 0.0.40
codegen_flags: <defaults>
</compile_context>

<pallas_src>
import numpy as np
import jax
import jax.numpy as jnp
from jax.experimental import pallas as pl
from jax.experimental.pallas import tpu as pltpu

try:  # use scipy's exact solver when present (same as the torch reference)
    from scipy.optimize import linear_sum_assignment as _scipy_lsap
except Exception:  # pragma: no cover
    _scipy_lsap = None

# ----------------------------- config (matches torch __init__ defaults) ------
CLS_MATCH_COST = 2.0
BOX_MATCH_COST = 5.0
GIOU_MATCH_COST = 2.0
CLS_LOSS_WEIGHT = 1.0
BOX_L1_LOSS_WEIGHT = 5.0
IOU_LOSS_WEIGHT = 2.0
ALPHA = 0.25
GAMMA = 2.0
NUM_CLASSES = 80
EPS = 1e-4

_MAX_BQ_TILE = 1024  # lane-dense BQ tile for both kernels (multiple of 128)


def _round_up(x, m):
    return ((x + m - 1) // m) * m


def _powg(x, gamma):
    # gamma is a static python float; special-case 2.0 (default) as a square.
    if float(gamma) == 2.0:
        return x * x
    return jnp.power(x, gamma)


def _cxcywh_to_xyxy(cx, cy, w, h):
    return cx - 0.5 * w, cy - 0.5 * h, cx + 0.5 * w, cy + 0.5 * h


def _giou(px0, py0, px1, py1, gx0, gy0, gx1, gy1, approx):
    """GIoU with broadcasting; clamps match the torch reference."""
    area_p = jnp.maximum((px1 - px0) * (py1 - py0), 0.0)
    area_g = jnp.maximum((gx1 - gx0) * (gy1 - gy0), 0.0)
    iw = jnp.maximum(jnp.minimum(px1, gx1) - jnp.maximum(px0, gx0), 0.0)
    ih = jnp.maximum(jnp.minimum(py1, gy1) - jnp.maximum(py0, gy0), 0.0)
    inter = jnp.maximum(iw * ih, 0.0)
    union = jnp.maximum(area_p + area_g - inter, EPS)
    ew = jnp.maximum(jnp.maximum(px1, gx1) - jnp.minimum(px0, gx0), 0.0)
    eh = jnp.maximum(jnp.maximum(py1, gy1) - jnp.minimum(py0, gy0), 0.0)
    enclose = jnp.maximum(ew * eh, EPS)
    if approx:
        iou = inter * pl.reciprocal(union, approx=True)
        return iou - (enclose - union) * pl.reciprocal(enclose, approx=True)
    iou = inter / union
    return iou - (enclose - union) / enclose


# ----------------------------- kernel 1: matching cost matrices --------------
def _cost_matrix_kernel(logits_t_ref, boxes_t_ref, gt_onehot_ref, gt_boxes_ref,
                        out_ref):
    # logits_t: (C, BQt) bf16; boxes_t: (4, BQt) f32; gt_onehot: (G_pad, C);
    # gt_boxes: (G_pad, 4); out: (G_pad, BQt) (gt rows, flattened queries cols)

    # ---- focal class cost on (C, BQt) FIRST (C=80 < G_pad), gather after ----
    # log-sigmoid identity: one exp + one log + one approx reciprocal.
    # NOTE: matching path only (@no_grad in reference); clip/+eps of the
    # reference are dropped here — negligible except at |logit| >~ 9.
    x = logits_t_ref[...].astype(jnp.float32)                 # (C, BQt)
    e = jnp.exp(-jnp.abs(x))
    log1pe = jnp.log(1.0 + e)
    log_p = jnp.minimum(x, 0.0) - log1pe                      # log sigmoid(x)
    log_1mp = -jnp.maximum(x, 0.0) - log1pe                   # log(1 - sigmoid(x))
    p = jnp.where(x >= 0.0, 1.0, e) * pl.reciprocal(1.0 + e, approx=True)
    pos_cls = ALPHA * _powg(1.0 - p, GAMMA) * (-log_p)
    neg_cls = (1.0 - ALPHA) * _powg(p, GAMMA) * (-log_1mp)
    cost_per_class = pos_cls - neg_cls                        # (C, BQt)

    # one-hot gather of the per-class cost via a single MXU matmul
    cls_cost = jnp.dot(gt_onehot_ref[...], cost_per_class,
                       preferred_element_type=jnp.float32)    # (G_pad, BQt)

    reg = jnp.clip(boxes_t_ref[...].astype(jnp.float32), EPS, 1.0 - EPS)  # (4, BQt)
    gtb = gt_boxes_ref[...].astype(jnp.float32)                           # (G_pad, 4)

    # torch.cdist(p=1): sum_k |gt[:, k, None] - reg[None, k, :]|
    box_cost = (jnp.abs(gtb[:, 0:1] - reg[0:1, :]) +
                jnp.abs(gtb[:, 1:2] - reg[1:2, :]) +
                jnp.abs(gtb[:, 2:3] - reg[2:3, :]) +
                jnp.abs(gtb[:, 3:4] - reg[3:4, :]))

    # cxcywh -> xyxy, pairwise GIoU
    px0, py0, px1, py1 = _cxcywh_to_xyxy(reg[0:1, :], reg[1:2, :],
                                         reg[2:3, :], reg[3:4, :])
    gx0, gy0, gx1, gy1 = _cxcywh_to_xyxy(gtb[:, 0:1], gtb[:, 1:2],
                                         gtb[:, 2:3], gtb[:, 3:4])
    giou = _giou(px0, py0, px1, py1, gx0, gy0, gx1, gy1, approx=True)

    out_ref[...] = (CLS_MATCH_COST * cls_cost
                    + BOX_MATCH_COST * box_cost
                    + GIOU_MATCH_COST * (-giou))


def compute_cost_matrices(logits_t, boxes_t, gt_onehot, gt_boxes, bq_tile):
    """logits_t (L,C,BQp) bf16, boxes_t (L,4,BQp) f32, gt_onehot (G_pad,C),
    gt_boxes (G_pad,4) -> cost (L, G_pad, BQp), all levels in one launch."""
    L, C, BQp = logits_t.shape
    G_pad = gt_onehot.shape[0]
    grid = (L, BQp // bq_tile)
    return pl.pallas_call(
        _cost_matrix_kernel,
        out_shape=jax.ShapeDtypeStruct((L, G_pad, BQp), jnp.float32),
        grid=grid,
        in_specs=[
            pl.BlockSpec((None, C, bq_tile), lambda l, t: (l, 0, t)),
            pl.BlockSpec((None, 4, bq_tile), lambda l, t: (l, 0, t)),
            pl.BlockSpec((G_pad, C), lambda l, t: (0, 0)),
            pl.BlockSpec((G_pad, 4), lambda l, t: (0, 0)),
        ],
        out_specs=pl.BlockSpec((None, G_pad, bq_tile), lambda l, t: (l, 0, t)),
        compiler_params=pltpu.CompilerParams(
            dimension_semantics=("parallel", "parallel")),
    )(logits_t, boxes_t, gt_onehot, gt_boxes)


# ------------------ kernel 2: per-level loss sums (focal + L1 + GIoU) --------
def _loss_kernel(logits_t_ref, labels_ref, mpred_ref, mtgt_ref, valid_ref,
                 cls_out_ref, l1_out_ref, giou_out_ref):
    # logits_t: (C, BQt) f32; labels: (1, BQt) int32 (NUM_CLASSES = "no object",
    # -1 = padded column); mpred/mtgt: (G_pad, 4); valid: (G_pad, 1);
    # outputs: (1, 1) per-level sums, accumulated across BQ tiles.
    t = pl.program_id(1)

    @pl.when(t == 0)
    def _():
        cls_out_ref[...] = jnp.zeros_like(cls_out_ref)
        # matched-pair L1 + diagonal GIoU: identical across BQ tiles, do once.
        pred = jnp.clip(mpred_ref[...].astype(jnp.float32), EPS, 1.0 - EPS)
        tgt = mtgt_ref[...].astype(jnp.float32)
        valid = valid_ref[...]
        l1_out_ref[...] = jnp.sum(valid * jnp.abs(pred - tgt), keepdims=True)
        px0, py0, px1, py1 = _cxcywh_to_xyxy(pred[:, 0:1], pred[:, 1:2],
                                             pred[:, 2:3], pred[:, 3:4])
        gx0, gy0, gx1, gy1 = _cxcywh_to_xyxy(tgt[:, 0:1], tgt[:, 1:2],
                                             tgt[:, 2:3], tgt[:, 3:4])
        giou = _giou(px0, py0, px1, py1, gx0, gy0, gx1, gy1,
                     approx=False)                               # (G_pad, 1)
        giou_out_ref[...] = jnp.sum(valid * (1.0 - giou), keepdims=True)

    # --- focal classification loss over this BQ tile (reference numerics) ---
    x = logits_t_ref[...].astype(jnp.float32)                    # (C, BQt)
    p = jnp.clip(jax.nn.sigmoid(x), EPS, 1.0 - EPS)
    labels = labels_ref[...]                                     # (1, BQt)
    cls_iota = jax.lax.broadcasted_iota(jnp.int32, p.shape, 0)
    is_pos = cls_iota == labels                                  # one-hot mask
    alpha_factor = jnp.where(is_pos, ALPHA, 1.0 - ALPHA)
    pt = jnp.where(is_pos, p, 1.0 - p)
    # gt*log(p) + (1-gt)*log(1-p) == log(pt) exactly for gt in {0,1}
    focal = alpha_factor * _powg(1.0 - pt, GAMMA) * (-jnp.log(pt))
    focal = jnp.where(labels >= 0, focal, 0.0)                   # mask BQ padding
    cls_out_ref[...] += jnp.sum(focal, keepdims=True)


def compute_level_losses(logits_t, labels, matched_pred, matched_tgt, valid,
                         bq_tile):
    L, C, BQp = logits_t.shape
    G_pad = matched_pred.shape[1]
    grid = (L, BQp // bq_tile)
    out_sds = jax.ShapeDtypeStruct((L, 1, 1), jnp.float32)
    return pl.pallas_call(
        _loss_kernel,
        out_shape=(out_sds, out_sds, out_sds),
        grid=grid,
        in_specs=[
            pl.BlockSpec((None, C, bq_tile), lambda l, t: (l, 0, t)),
            pl.BlockSpec((None, 1, bq_tile), lambda l, t: (l, 0, t)),
            pl.BlockSpec((None, G_pad, 4), lambda l, t: (l, 0, 0)),
            pl.BlockSpec((None, G_pad, 4), lambda l, t: (l, 0, 0)),
            pl.BlockSpec((G_pad, 1), lambda l, t: (0, 0)),
        ],
        out_specs=(
            pl.BlockSpec((None, 1, 1), lambda l, t: (l, 0, 0)),
            pl.BlockSpec((None, 1, 1), lambda l, t: (l, 0, 0)),
            pl.BlockSpec((None, 1, 1), lambda l, t: (l, 0, 0)),
        ),
        compiler_params=pltpu.CompilerParams(
            dimension_semantics=("parallel", "arbitrary")),
    )(logits_t, labels, matched_pred, matched_tgt, valid)


# ----------------------------- host-side Hungarian matching ------------------
# TODO(synk): the Hungarian assignment (scipy.optimize.linear_sum_assignment in
# the reference) is inherently sequential and has no Pallas equivalent; it runs
# on host over the Pallas-computed cost matrices (scipy if present, otherwise a
# pure-numpy Jonker-Volgenant shortest-augmenting-path solver).
def _lsap_numpy(cost):
    cost = np.asarray(cost, dtype=np.float64)
    nr, nc = cost.shape
    if nr == 0 or nc == 0:
        return np.zeros(0, np.int64), np.zeros(0, np.int64)
    transposed = False
    if nc < nr:
        cost = cost.transpose().copy()
        nr, nc = cost.shape
        transposed = True
    u = np.zeros(nr, np.float64)
    v = np.zeros(nc, np.float64)
    shortest = np.empty(nc, np.float64)
    path = np.full(nc, -1, np.int64)
    col4row = np.full(nr, -1, np.int64)
    row4col = np.full(nc, -1, np.int64)
    SR = np.zeros(nr, bool)
    SC = np.zeros(nc, bool)
    for cur_row in range(nr):
        min_val = 0.0
        i = cur_row
        remaining = list(range(nc))
        num_remaining = nc
        SR[:] = False
        SC[:] = False
        shortest[:] = np.inf
        sink = -1
        while sink == -1:
            index = -1
            lowest = np.inf
            SR[i] = True
            for it in range(num_remaining):
                j = remaining[it]
                r = min_val + cost[i, j] - u[i] - v[j]
                if r < shortest[j]:
                    path[j] = i
                    shortest[j] = r
                if (shortest[j] < lowest
                        or (shortest[j] == lowest and row4col[j] == -1)):
                    lowest = shortest[j]
                    index = it
            min_val = lowest
            if not np.isfinite(min_val):
                raise ValueError('cost matrix is infeasible')
            j = remaining[index]
            if row4col[j] == -1:
                sink = j
            else:
                i = row4col[j]
            SC[j] = True
            num_remaining -= 1
            remaining[index] = remaining[num_remaining]
        u[cur_row] += min_val
        for irow in range(nr):
            if SR[irow] and irow != cur_row:
                u[irow] += min_val - shortest[col4row[irow]]
        for jcol in range(nc):
            if SC[jcol]:
                v[jcol] -= min_val - shortest[jcol]
        j = sink
        while True:
            irow = path[j]
            row4col[j] = irow
            col4row[irow], j = j, col4row[irow]
            if irow == cur_row:
                break
    if transposed:
        row_ind = col4row.astype(np.int64)
        col_ind = np.arange(nr, dtype=np.int64)
        order = np.argsort(row_ind)
        return row_ind[order], col_ind[order]
    return np.arange(nr, dtype=np.int64), col4row.astype(np.int64)


def _linear_sum_assignment_with_inf(cost_matrix):
    cost_matrix = np.asarray(cost_matrix, dtype=np.float64).copy()
    if np.isnan(cost_matrix).any():
        cost_matrix[np.isnan(cost_matrix)] = 100000.0
    min_inf = np.isneginf(cost_matrix).any()
    max_inf = np.isposinf(cost_matrix).any()
    if min_inf and max_inf:
        raise ValueError('matrix contains both inf and -inf')
    if min_inf or max_inf:
        values = cost_matrix[~np.isinf(cost_matrix)]
        min_values, max_values = values.min(), values.max()
        m = min(cost_matrix.shape)
        positive = m * (max_values - min_values + np.abs(max_values)
                        + np.abs(min_values) + 1)
        if max_inf:
            place_holder = max_values + (m - 1) * (max_values - min_values) + positive
        else:
            place_holder = min_values + (m - 1) * (min_values - max_values) - positive
        cost_matrix[np.isinf(cost_matrix)] = place_holder
    if _scipy_lsap is not None:
        r, c = _scipy_lsap(cost_matrix)
        return np.asarray(r, np.int64), np.asarray(c, np.int64)
    return _lsap_numpy(cost_matrix)


# ----------------------------- full forward ----------------------------------
def dino_detr_loss(preds, annotations):
    """Forward pass of DINODETRLoss. `annotations` is a list of (M_i, 5) arrays."""
    levels = [('', preds['pred_logits'], preds['pred_boxes'])]
    for idx, per_level in enumerate(preds.get('aux_outputs', []) or []):
        levels.append((f'_aux_layer_{idx}',
                       per_level['pred_logits'], per_level['pred_boxes']))
    if 'interm_outputs' in preds:
        io = preds['interm_outputs']
        levels.append(('_interm', io['pred_logits'], io['pred_boxes']))
    L = len(levels)
    B, Q, C = levels[0][1].shape
    BQ = B * Q

    # TODO(synk): denoising (dn_meta) branch not exercised; inputs carry
    # dn_meta=None so the reference forward skips it as well.

    anns_np = [np.asarray(jax.device_get(a), dtype=np.float32) for a in annotations]
    filt = [a[a[:, 4] >= 0.0] for a in anns_np]
    counts = [int(f.shape[0]) for f in filt]
    G = int(sum(counts))

    loss_dict = {}
    if G == 0:
        # TODO(synk): reference would divide by zero here; return zeros instead.
        z = jnp.float32(0.0)
        for suffix, _, _ in levels:
            loss_dict['cls_loss' + suffix] = z
            loss_dict['box_l1_loss' + suffix] = z
            loss_dict['box_iou_loss' + suffix] = z
        return loss_dict

    # ---- static-shape GT prep (small power-of-two bucket, min 8 rows) ----
    G_pad = max(8, 1 << (G - 1).bit_length())
    gt_all = np.concatenate(filt, axis=0).astype(np.float32)       # (G, 5)
    gt_boxes_pad = np.zeros((G_pad, 4), np.float32)
    gt_boxes_pad[:G] = gt_all[:, :4]
    gt_labels = gt_all[:, 4].astype(np.int64)
    gt_onehot = np.zeros((G_pad, C), np.float32)
    gt_onehot[np.arange(G), gt_labels] = 1.0
    valid_np = np.zeros((G_pad, 1), np.float32)
    valid_np[:G, 0] = 1.0

    # ---- BQ tiling: lane-dense tiles, padded to a tile multiple ----
    if BQ <= _MAX_BQ_TILE:
        bq_tile, BQ_pad = BQ, BQ
    else:
        bq_tile, BQ_pad = _MAX_BQ_TILE, _round_up(BQ, _MAX_BQ_TILE)

    # ---- single transposed (L, C, BQ_pad) logits array feeds BOTH kernels ----
    logits_t = jnp.stack(
        [jnp.transpose(cl.astype(jnp.float32).reshape(BQ, C), (1, 0))
         for _, cl, _ in levels])                                  # (L, C, BQ)
    boxes_flat = jnp.stack([rg.astype(jnp.float32).reshape(BQ, 4)
                            for _, _, rg in levels])               # (L, BQ, 4)
    boxes_t = jnp.transpose(boxes_flat, (0, 2, 1))                 # (L, 4, BQ)
    if BQ_pad > BQ:
        pad = BQ_pad - BQ
        logits_t = jnp.pad(logits_t, ((0, 0), (0, 0), (0, pad)))
        boxes_t = jnp.pad(boxes_t, ((0, 0), (0, 0), (0, pad)))
    logits_t_bf16 = logits_t.astype(jnp.bfloat16)  # matching kernel only

    # ---- kernel 1: all matching cost matrices, single (sliced) D2H sync ----
    cost = compute_cost_matrices(logits_t_bf16, boxes_t,
                                 jnp.asarray(gt_onehot),
                                 jnp.asarray(gt_boxes_pad), bq_tile)
    cost_np = np.asarray(jax.device_get(cost[:, :G, :BQ]))         # (L, G, BQ)

    # ---- host Hungarian matching per level / image ----
    labels_np = np.full((L, 1, BQ_pad), -1, np.int32)   # -1 = padded column
    labels_np[:, 0, :BQ] = C                             # C == "no object"
    flat_src_np = np.zeros((L, G_pad), np.int32)
    matched_tgt_np = np.zeros((L, G_pad, 4), np.float32)
    for l in range(L):
        off = 0
        row = 0
        for b in range(B):
            g = counts[b]
            if g == 0:
                continue
            sub = cost_np[l, off:off + g, b * Q:(b + 1) * Q].T      # (Q, g)
            src, tgt_j = _linear_sum_assignment_with_inf(sub)
            labels_np[l, 0, b * Q + src] = filt[b][:, 4][tgt_j].astype(np.int32)
            flat_src_np[l, row:row + g] = (b * Q + src).astype(np.int32)
            matched_tgt_np[l, row:row + g] = filt[b][:, 0:4][tgt_j]
            off += g
            row += g

    # ---- gather matched predicted boxes on device (one XLA gather) ----
    flat_src = jnp.asarray(flat_src_np)                              # (L, G_pad)
    matched_pred = boxes_flat[jnp.arange(L)[:, None], flat_src, :]   # (L, G_pad, 4)

    # ---- kernel 2: all per-level loss sums in one launch ----
    cls_sums, l1_sums, giou_sums = compute_level_losses(
        logits_t, jnp.asarray(labels_np), matched_pred,
        jnp.asarray(matched_tgt_np), jnp.asarray(valid_np), bq_tile)

    inv_g = jnp.float32(1.0 / G)
    for l, (suffix, _, _) in enumerate(levels):
        loss_dict['cls_loss' + suffix] = CLS_LOSS_WEIGHT * cls_sums[l, 0, 0] * inv_g
        loss_dict['box_l1_loss' + suffix] = BOX_L1_LOSS_WEIGHT * l1_sums[l, 0, 0] * inv_g
        loss_dict['box_iou_loss' + suffix] = IOU_LOSS_WEIGHT * giou_sums[l, 0, 0] * inv_g
    return loss_dict


# ----------------------------- demo ------------------------------------------
if __name__ == "__main__":
    B, Q, C = 2, 8, NUM_CLASSES
    key = jax.random.PRNGKey(0)
    k1, k2, k3, k4, k5, k6 = jax.random.split(key, 6)

    pred_logits = jax.random.normal(k1, (B, Q, C), dtype=jnp.float32)
    pred_boxes = jax.random.uniform(k2, (B, Q, 4), dtype=jnp.float32,
                                    minval=0.1, maxval=0.6)
    aux_logits = jax.random.normal(k3, (B, Q, C), dtype=jnp.float32)
    aux_boxes = jax.random.uniform(k4, (B, Q, 4), dtype=jnp.float32,
                                   minval=0.1, maxval=0.6)
    interm_logits = jax.random.normal(k5, (B, Q, C), dtype=jnp.float32)
    interm_boxes = jax.random.uniform(k6, (B, Q, 4), dtype=jnp.float32,
                                      minval=0.1, maxval=0.6)

    # per-image annotations: (M, 5) [cx, cy, w, h, label]; label -1 = padding
    ann0 = jnp.array([[0.30, 0.30, 0.20, 0.20, 5.0],
                      [0.60, 0.60, 0.25, 0.25, 12.0],
                      [0.50, 0.20, 0.10, 0.30, 40.0],
                      [0.00, 0.00, 0.00, 0.00, -1.0]], dtype=jnp.float32)
    ann1 = jnp.array([[0.40, 0.50, 0.30, 0.20, 7.0],
                      [0.70, 0.30, 0.15, 0.25, 63.0],
                      [0.00, 0.00, 0.00, 0.00, -1.0],
                      [0.00, 0.00, 0.00, 0.00, -1.0]], dtype=jnp.float32)
    annotations = [ann0, ann1]

    preds = {
        'pred_logits': pred_logits,
        'pred_boxes': pred_boxes,
        'dn_meta': None,
        'aux_outputs': [{'pred_logits': aux_logits, 'pred_boxes': aux_boxes}],
        'interm_outputs': {'pred_logits': interm_logits, 'pred_boxes': interm_boxes},
    }

    losses = dino_detr_loss(preds, annotations)
    for v in losses.values():
        jax.block_until_ready(v)
    print("KERNEL_OK")
</pallas_src>

<mosaic_0001>
module attributes {stable_mosaic.version = 11 : i64} {
  func.func @_cost_matrix_kernel(%arg0: i32, %arg1: i32, %arg2: memref<1x80x16xbf16, #tpu.memory_space<vmem>>, %arg3: memref<1x4x16xf32, #tpu.memory_space<vmem>>, %arg4: memref<8x80xf32, #tpu.memory_space<vmem>>, %arg5: memref<8x4xf32, #tpu.memory_space<vmem>>, %arg6: memref<1x8x16xf32, #tpu.memory_space<vmem>>) attributes {dimension_semantics = [#tpu.dimension_semantics<parallel>, #tpu.dimension_semantics<parallel>], iteration_bounds = array<i64: 3, 1>, scalar_prefetch = 0 : i64, scratch_operands = 0 : i64, tpu.core_type = #tpu.core_type<tc>, window_params = [{transform_indices = @transform_0, window_bounds = array<i64: 1, 80, 16>}, {transform_indices = @transform_1, window_bounds = array<i64: 1, 4, 16>}, {pipeline_mode = #tpu.pipeline_mode<synchronous>, transform_indices = @transform_2, window_bounds = array<i64: 8, 80>}, {pipeline_mode = #tpu.pipeline_mode<synchronous>, transform_indices = @transform_3, window_bounds = array<i64: 8, 4>}, {transform_indices = @transform_4, window_bounds = array<i64: 1, 8, 16>}]} {
    %c0 = arith.constant 0 : index
    %c0_0 = arith.constant 0 : index
    %c0_1 = arith.constant 0 : index
    %0 = vector.load %arg2[%c0, %c0_0, %c0_1] : memref<1x80x16xbf16, #tpu.memory_space<vmem>>, vector<1x80x16xbf16>
    %1 = vector.shape_cast %0 : vector<1x80x16xbf16> to vector<80x16xbf16>
    %2 = arith.extf %1 : vector<80x16xbf16> to vector<80x16xf32>
    %3 = math.absf %2 : vector<80x16xf32>
    %cst = arith.constant 0.000000e+00 : f32
    %4 = vector.broadcast %cst : f32 to vector<80x16xf32>
    %5 = arith.subf %4, %3 : vector<80x16xf32>
    %6 = math.exp %5 : vector<80x16xf32>
    %cst_2 = arith.constant 1.000000e+00 : f32
    %7 = vector.broadcast %cst_2 : f32 to vector<80x16xf32>
    %8 = arith.addf %7, %6 : vector<80x16xf32>
    %9 = math.log %8 : vector<80x16xf32>
    %cst_3 = arith.constant 0.000000e+00 : f32
    %10 = vector.broadcast %cst_3 : f32 to vector<80x16xf32>
    %11 = arith.minimumf %2, %10 : vector<80x16xf32>
    %12 = arith.subf %11, %9 : vector<80x16xf32>
    %cst_4 = arith.constant 0.000000e+00 : f32
    %13 = vector.broadcast %cst_4 : f32 to vector<80x16xf32>
    %14 = arith.maximumf %2, %13 : vector<80x16xf32>
    %cst_5 = arith.constant 0.000000e+00 : f32
    %15 = vector.broadcast %cst_5 : f32 to vector<80x16xf32>
    %16 = arith.subf %15, %14 : vector<80x16xf32>
    %17 = arith.subf %16, %9 : vector<80x16xf32>
    %cst_6 = arith.constant 0.000000e+00 : f32
    %18 = vector.broadcast %cst_6 : f32 to vector<80x16xf32>
    %19 = arith.cmpf oge, %2, %18 : vector<80x16xf32>
    %cst_7 = arith.constant 1.000000e+00 : f32
    %20 = vector.broadcast %cst_7 : f32 to vector<80x16xf32>
    %21 = arith.select %19, %20, %6 : vector<80x16xi1>, vector<80x16xf32>
    %cst_8 = arith.constant 1.000000e+00 : f32
    %22 = vector.broadcast %cst_8 : f32 to vector<80x16xf32>
    %23 = arith.addf %22, %6 : vector<80x16xf32>
    %24 = tpu.reciprocal %23 {approx = true} : vector<80x16xf32> -> vector<80x16xf32>
    %25 = arith.mulf %21, %24 : vector<80x16xf32>
    %cst_9 = arith.constant 1.000000e+00 : f32
    %26 = vector.broadcast %cst_9 : f32 to vector<80x16xf32>
    %27 = arith.subf %26, %25 : vector<80x16xf32>
    %28 = arith.mulf %27, %27 : vector<80x16xf32>
    %cst_10 = arith.constant 2.500000e-01 : f32
    %29 = vector.broadcast %cst_10 : f32 to vector<80x16xf32>
    %30 = arith.mulf %29, %28 : vector<80x16xf32>
    %cst_11 = arith.constant 0.000000e+00 : f32
    %31 = vector.broadcast %cst_11 : f32 to vector<80x16xf32>
    %32 = arith.subf %31, %12 : vector<80x16xf32>
    %33 = arith.mulf %30, %32 : vector<80x16xf32>
    %34 = arith.mulf %25, %25 : vector<80x16xf32>
    %cst_12 = arith.constant 7.500000e-01 : f32
    %35 = vector.broadcast %cst_12 : f32 to vector<80x16xf32>
    %36 = arith.mulf %35, %34 : vector<80x16xf32>
    %cst_13 = arith.constant 0.000000e+00 : f32
    %37 = vector.broadcast %cst_13 : f32 to vector<80x16xf32>
    %38 = arith.subf %37, %17 : vector<80x16xf32>
    %39 = arith.mulf %36, %38 : vector<80x16xf32>
    %40 = arith.subf %33, %39 : vector<80x16xf32>
    %c0_14 = arith.constant 0 : index
    %c0_15 = arith.constant 0 : index
    %41 = vector.load %arg4[%c0_14, %c0_15] : memref<8x80xf32, #tpu.memory_space<vmem>>, vector<8x80xf32>
    %cst_16 = arith.constant dense<0.000000e+00> : vector<8x16xf32>
    %42 = tpu.matmul %41, %40, %cst_16 {dimension_numbers = #tpu.dot_dimension_numbers<[1], [0], [0], [1], [0, 0, 1, 1], [], []>} : vector<8x80xf32>, vector<80x16xf32>, vector<8x16xf32> -> vector<8x16xf32>
    %c0_17 = arith.constant 0 : index
    %c0_18 = arith.constant 0 : index
    %c0_19 = arith.constant 0 : index
    %43 = vector.load %arg3[%c0_17, %c0_18, %c0_19] : memref<1x4x16xf32, #tpu.memory_space<vmem>>, vector<1x4x16xf32>
    %44 = vector.shape_cast %43 : vector<1x4x16xf32> to vector<4x16xf32>
    %cst_20 = arith.constant 9.99999974E-5 : f32
    %cst_21 = arith.constant 0.999899983 : f32
    %45 = vector.broadcast %cst_20 : f32 to vector<4x16xf32>
    %46 = arith.maximumf %45, %44 : vector<4x16xf32>
    %47 = vector.broadcast %cst_21 : f32 to vector<4x16xf32>
    %48 = arith.minimumf %47, %46 : vector<4x16xf32>
    %c0_22 = arith.constant 0 : index
    %c0_23 = arith.constant 0 : index
    %49 = vector.load %arg5[%c0_22, %c0_23] : memref<8x4xf32, #tpu.memory_space<vmem>>, vector<8x4xf32>
    %50 = vector.extract_strided_slice %49 {offsets = [0, 0], sizes = [8, 1], strides = [1, 1]} : vector<8x4xf32> to vector<8x1xf32>
    %51 = vector.extract_strided_slice %48 {offsets = [0, 0], sizes = [1, 16], strides = [1, 1]} : vector<4x16xf32> to vector<1x16xf32>
    %52 = vector.broadcast %50 : vector<8x1xf32> to vector<8x16xf32>
    %53 = vector.broadcast %51 : vector<1x16xf32> to vector<8x16xf32>
    %54 = arith.subf %52, %53 : vector<8x16xf32>
    %55 = math.absf %54 : vector<8x16xf32>
    %56 = vector.extract_strided_slice %49 {offsets = [0, 1], sizes = [8, 1], strides = [1, 1]} : vector<8x4xf32> to vector<8x1xf32>
    %57 = vector.extract_strided_slice %48 {offsets = [1, 0], sizes = [1, 16], strides = [1, 1]} : vector<4x16xf32> to vector<1x16xf32>
    %58 = vector.broadcast %56 : vector<8x1xf32> to vector<8x16xf32>
    %59 = vector.broadcast %57 : vector<1x16xf32> to vector<8x16xf32>
    %60 = arith.subf %58, %59 : vector<8x16xf32>
    %61 = math.absf %60 : vector<8x16xf32>
    %62 = arith.addf %55, %61 : vector<8x16xf32>
    %63 = vector.extract_strided_slice %49 {offsets = [0, 2], sizes = [8, 1], strides = [1, 1]} : vector<8x4xf32> to vector<8x1xf32>
    %64 = vector.extract_strided_slice %48 {offsets = [2, 0], sizes = [1, 16], strides = [1, 1]} : vector<4x16xf32> to vector<1x16xf32>
    %65 = vector.broadcast %63 : vector<8x1xf32> to vector<8x16xf32>
    %66 = vector.broadcast %64 : vector<1x16xf32> to vector<8x16xf32>
    %67 = arith.subf %65, %66 : vector<8x16xf32>
    %68 = math.absf %67 : vector<8x16xf32>
    %69 = arith.addf %62, %68 : vector<8x16xf32>
    %70 = vector.extract_strided_slice %49 {offsets = [0, 3], sizes = [8, 1], strides = [1, 1]} : vector<8x4xf32> to vector<8x1xf32>
    %71 = vector.extract_strided_slice %48 {offsets = [3, 0], sizes = [1, 16], strides = [1, 1]} : vector<4x16xf32> to vector<1x16xf32>
    %72 = vector.broadcast %70 : vector<8x1xf32> to vector<8x16xf32>
    %73 = vector.broadcast %71 : vector<1x16xf32> to vector<8x16xf32>
    %74 = arith.subf %72, %73 : vector<8x16xf32>
    %75 = math.absf %74 : vector<8x16xf32>
    %76 = arith.addf %69, %75 : vector<8x16xf32>
    %77 = vector.extract_strided_slice %48 {offsets = [0, 0], sizes = [1, 16], strides = [1, 1]} : vector<4x16xf32> to vector<1x16xf32>
    %78 = vector.extract_strided_slice %48 {offsets = [1, 0], sizes = [1, 16], strides = [1, 1]} : vector<4x16xf32> to vector<1x16xf32>
    %79 = vector.extract_strided_slice %48 {offsets = [2, 0], sizes = [1, 16], strides = [1, 1]} : vector<4x16xf32> to vector<1x16xf32>
    %80 = vector.extract_strided_slice %48 {offsets = [3, 0], sizes = [1, 16], strides = [1, 1]} : vector<4x16xf32> to vector<1x16xf32>
    %cst_24 = arith.constant 5.000000e-01 : f32
    %81 = vector.broadcast %cst_24 : f32 to vector<1x16xf32>
    %82 = arith.mulf %81, %79 : vector<1x16xf32>
    %83 = arith.subf %77, %82 : vector<1x16xf32>
    %cst_25 = arith.constant 5.000000e-01 : f32
    %84 = vector.broadcast %cst_25 : f32 to vector<1x16xf32>
    %85 = arith.mulf %84, %80 : vector<1x16xf32>
    %86 = arith.subf %78, %85 : vector<1x16xf32>
    %cst_26 = arith.constant 5.000000e-01 : f32
    %87 = vector.broadcast %cst_26 : f32 to vector<1x16xf32>
    %88 = arith.mulf %87, %79 : vector<1x16xf32>
    %89 = arith.addf %77, %88 : vector<1x16xf32>
    %cst_27 = arith.constant 5.000000e-01 : f32
    %90 = vector.broadcast %cst_27 : f32 to vector<1x16xf32>
    %91 = arith.mulf %90, %80 : vector<1x16xf32>
    %92 = arith.addf %78, %91 : vector<1x16xf32>
    %93 = vector.extract_strided_slice %49 {offsets = [0, 0], sizes = [8, 1], strides = [1, 1]} : vector<8x4xf32> to vector<8x1xf32>
    %94 = vector.extract_strided_slice %49 {offsets = [0, 1], sizes = [8, 1], strides = [1, 1]} : vector<8x4xf32> to vector<8x1xf32>
    %95 = vector.extract_strided_slice %49 {offsets = [0, 2], sizes = [8, 1], strides = [1, 1]} : vector<8x4xf32> to vector<8x1xf32>
    %96 = vector.extract_strided_slice %49 {offsets = [0, 3], sizes = [8, 1], strides = [1, 1]} : vector<8x4xf32> to vector<8x1xf32>
    %cst_28 = arith.constant 5.000000e-01 : f32
    %97 = vector.broadcast %cst_28 : f32 to vector<8x1xf32>
    %98 = arith.mulf %97, %95 : vector<8x1xf32>
    %99 = arith.subf %93, %98 : vector<8x1xf32>
    %cst_29 = arith.constant 5.000000e-01 : f32
    %100 = vector.broadcast %cst_29 : f32 to vector<8x1xf32>
    %101 = arith.mulf %100, %96 : vector<8x1xf32>
    %102 = arith.subf %94, %101 : vector<8x1xf32>
    %cst_30 = arith.constant 5.000000e-01 : f32
    %103 = vector.broadcast %cst_30 : f32 to vector<8x1xf32>
    %104 = arith.mulf %103, %95 : vector<8x1xf32>
    %105 = arith.addf %93, %104 : vector<8x1xf32>
    %cst_31 = arith.constant 5.000000e-01 : f32
    %106 = vector.broadcast %cst_31 : f32 to vector<8x1xf32>
    %107 = arith.mulf %106, %96 : vector<8x1xf32>
    %108 = arith.addf %94, %107 : vector<8x1xf32>
    %109 = arith.subf %89, %83 : vector<1x16xf32>
    %110 = arith.subf %92, %86 : vector<1x16xf32>
    %111 = arith.mulf %109, %110 : vector<1x16xf32>
    %cst_32 = arith.constant 0.000000e+00 : f32
    %112 = vector.broadcast %cst_32 : f32 to vector<1x16xf32>
    %113 = arith.maximumf %111, %112 : vector<1x16xf32>
    %114 = arith.subf %105, %99 : vector<8x1xf32>
    %115 = arith.subf %108, %102 : vector<8x1xf32>
    %116 = arith.mulf %114, %115 : vector<8x1xf32>
    %cst_33 = arith.constant 0.000000e+00 : f32
    %117 = vector.broadcast %cst_33 : f32 to vector<8x1xf32>
    %118 = arith.maximumf %116, %117 : vector<8x1xf32>
    %119 = vector.broadcast %89 : vector<1x16xf32> to vector<8x16xf32>
    %120 = vector.broadcast %105 : vector<8x1xf32> to vector<8x16xf32>
    %121 = arith.minimumf %119, %120 : vector<8x16xf32>
    %122 = vector.broadcast %83 : vector<1x16xf32> to vector<8x16xf32>
    %123 = vector.broadcast %99 : vector<8x1xf32> to vector<8x16xf32>
    %124 = arith.maximumf %122, %123 : vector<8x16xf32>
    %125 = arith.subf %121, %124 : vector<8x16xf32>
    %cst_34 = arith.constant 0.000000e+00 : f32
    %126 = vector.broadcast %cst_34 : f32 to vector<8x16xf32>
    %127 = arith.maximumf %125, %126 : vector<8x16xf32>
    %128 = vector.broadcast %92 : vector<1x16xf32> to vector<8x16xf32>
    %129 = vector.broadcast %108 : vector<8x1xf32> to vector<8x16xf32>
    %130 = arith.minimumf %128, %129 : vector<8x16xf32>
    %131 = vector.broadcast %86 : vector<1x16xf32> to vector<8x16xf32>
    %132 = vector.broadcast %102 : vector<8x1xf32> to vector<8x16xf32>
    %133 = arith.maximumf %131, %132 : vector<8x16xf32>
    %134 = arith.subf %130, %133 : vector<8x16xf32>
    %cst_35 = arith.constant 0.000000e+00 : f32
    %135 = vector.broadcast %cst_35 : f32 to vector<8x16xf32>
    %136 = arith.maximumf %134, %135 : vector<8x16xf32>
    %137 = arith.mulf %127, %136 : vector<8x16xf32>
    %cst_36 = arith.constant 0.000000e+00 : f32
    %138 = vector.broadcast %cst_36 : f32 to vector<8x16xf32>
    %139 = arith.maximumf %137, %138 : vector<8x16xf32>
    %140 = vector.broadcast %113 : vector<1x16xf32> to vector<8x16xf32>
    %141 = vector.broadcast %118 : vector<8x1xf32> to vector<8x16xf32>
    %142 = arith.addf %140, %141 : vector<8x16xf32>
    %143 = arith.subf %142, %139 : vector<8x16xf32>
    %cst_37 = arith.constant 9.99999974E-5 : f32
    %144 = vector.broadcast %cst_37 : f32 to vector<8x16xf32>
    %145 = arith.maximumf %143, %144 : vector<8x16xf32>
    %146 = vector.broadcast %89 : vector<1x16xf32> to vector<8x16xf32>
    %147 = vector.broadcast %105 : vector<8x1xf32> to vector<8x16xf32>
    %148 = arith.maximumf %146, %147 : vector<8x16xf32>
    %149 = vector.broadcast %83 : vector<1x16xf32> to vector<8x16xf32>
    %150 = vector.broadcast %99 : vector<8x1xf32> to vector<8x16xf32>
    %151 = arith.minimumf %149, %150 : vector<8x16xf32>
    %152 = arith.subf %148, %151 : vector<8x16xf32>
    %cst_38 = arith.constant 0.000000e+00 : f32
    %153 = vector.broadcast %cst_38 : f32 to vector<8x16xf32>
    %154 = arith.maximumf %152, %153 : vector<8x16xf32>
    %155 = vector.broadcast %92 : vector<1x16xf32> to vector<8x16xf32>
    %156 = vector.broadcast %108 : vector<8x1xf32> to vector<8x16xf32>
    %157 = arith.maximumf %155, %156 : vector<8x16xf32>
    %158 = vector.broadcast %86 : vector<1x16xf32> to vector<8x16xf32>
    %159 = vector.broadcast %102 : vector<8x1xf32> to vector<8x16xf32>
    %160 = arith.minimumf %158, %159 : vector<8x16xf32>
    %161 = arith.subf %157, %160 : vector<8x16xf32>
    %cst_39 = arith.constant 0.000000e+00 : f32
    %162 = vector.broadcast %cst_39 : f32 to vector<8x16xf32>
    %163 = arith.maximumf %161, %162 : vector<8x16xf32>
    %164 = arith.mulf %154, %163 : vector<8x16xf32>
    %cst_40 = arith.constant 9.99999974E-5 : f32
    %165 = vector.broadcast %cst_40 : f32 to vector<8x16xf32>
    %166 = arith.maximumf %164, %165 : vector<8x16xf32>
    %167 = tpu.reciprocal %145 {approx = true} : vector<8x16xf32> -> vector<8x16xf32>
    %168 = arith.mulf %139, %167 : vector<8x16xf32>
    %169 = arith.subf %166, %145 : vector<8x16xf32>
    %170 = tpu.reciprocal %166 {approx = true} : vector<8x16xf32> -> vector<8x16xf32>
    %171 = arith.mulf %169, %170 : vector<8x16xf32>
    %172 = arith.subf %168, %171 : vector<8x16xf32>
    %cst_41 = arith.constant 2.000000e+00 : f32
    %173 = vector.broadcast %cst_41 : f32 to vector<8x16xf32>
    %174 = arith.mulf %173, %42 : vector<8x16xf32>
    %cst_42 = arith.constant 5.000000e+00 : f32
    %175 = vector.broadcast %cst_42 : f32 to vector<8x16xf32>
    %176 = arith.mulf %175, %76 : vector<8x16xf32>
    %177 = arith.addf %174, %176 : vector<8x16xf32>
    %cst_43 = arith.constant 0.000000e+00 : f32
    %178 = vector.broadcast %cst_43 : f32 to vector<8x16xf32>
    %179 = arith.subf %178, %172 : vector<8x16xf32>
    %cst_44 = arith.constant 2.000000e+00 : f32
    %180 = vector.broadcast %cst_44 : f32 to vector<8x16xf32>
    %181 = arith.mulf %180, %179 : vector<8x16xf32>
    %182 = arith.addf %177, %181 : vector<8x16xf32>
    %c0_45 = arith.constant 0 : index
    %c0_46 = arith.constant 0 : index
    %c0_47 = arith.constant 0 : index
    %183 = vector.load %arg6[%c0_45, %c0_46, %c0_47] : memref<1x8x16xf32, #tpu.memory_space<vmem>>, vector<1x8x16xf32>
    %184 = vector.shape_cast %183 : vector<1x8x16xf32> to vector<8x16xf32>
    %185 = vector.shape_cast %182 : vector<8x16xf32> to vector<1x8x16xf32>
    tpu.vector_store %arg6[%c0_45, %c0_46, %c0_47], %185 {strides = array<i32>} : memref<1x8x16xf32, #tpu.memory_space<vmem>>, vector<1x8x16xf32>,
    return
  }
  func.func @transform_0(%arg0: i32, %arg1: i32) -> (i32, i32, i32) {
    %c0_i32 = arith.constant 0 : i32
    %c0_i32_0 = arith.constant 0 : i32
    return %arg0, %c0_i32, %arg1 : i32, i32, i32
  }
  func.func @transform_1(%arg0: i32, %arg1: i32) -> (i32, i32, i32) {
    %c0_i32 = arith.constant 0 : i32
    %c0_i32_0 = arith.constant 0 : i32
    return %arg0, %c0_i32, %arg1 : i32, i32, i32
  }
  func.func @transform_2(%arg0: i32, %arg1: i32) -> (i32, i32) {
    %c0_i32 = arith.constant 0 : i32
    %c0_i32_0 = arith.constant 0 : i32
    %c0_i32_1 = arith.constant 0 : i32
    return %c0_i32, %c0_i32_0 : i32, i32
  }
  func.func @transform_3(%arg0: i32, %arg1: i32) -> (i32, i32) {
    %c0_i32 = arith.constant 0 : i32
    %c0_i32_0 = arith.constant 0 : i32
    %c0_i32_1 = arith.constant 0 : i32
    return %c0_i32, %c0_i32_0 : i32, i32
  }
  func.func @transform_4(%arg0: i32, %arg1: i32) -> (i32, i32, i32) {
    %c0_i32 = arith.constant 0 : i32
    %c0_i32_0 = arith.constant 0 : i32
    return %arg0, %c0_i32, %arg1 : i32, i32, i32
  }
}

</mosaic_0001>

<bundles_post_ra>
// kernel: tpu_custom_call.1
= control target key start
LH: loop header
LB: loop body
LE: loop exit
PB: predicated region body
PF: predicated region fallthrough
CT: control target
= control target key end

     0   :  { %9 = vsyncpa [#allocation3], 0  ;;  %s1272_s0 = inlined_call_operand.vmem [shape: bf16[3,80,16], index: 0, kind: input, shape index: {}]   ;;  %s1273_s1 = inlined_call_operand.vmem [shape: f32[3,4,16], index: 1, kind: input, shape index: {}]   ;;  %s1274_s2 = inlined_call_operand.vmem [shape: f32[8,80], index: 2, kind: input, shape index: {}]   ;;  %s1275_s3 = inlined_call_operand.vmem [shape: f32[8,4], index: 3, kind: input, shape index: {}]   ;;  %s1276_s4 = inlined_call_operand.hbm [shape: f32[3,8,16], index: 4, kind: output, shape index: {}]  }
   0x1   :  { %11 = vsyncpa [#allocation3 + $0x1], 0  ;;  %s1066_s15 = smov 0   ;;  %s1068_s16 = smov 0  }
   0x2   :  { %s1070_s17 = smov 0   ;;  %s1072_s18 = smov 0  }
   0x3   :  { %s1074_s19 = smov 0   ;;  %s1076_s20 = smov 0  }
   0x4 LB: > { %s787_s21 = sadd.s32 4294967295, %s1033_s20   ;;  %s788_s22 = sadd.s32 4294967294, %s1033_s20   ;;  %s1033_s20 = sphi %s1076_s20, %s17_s20   ;;  %s1029_s19 = sphi %s1074_s19, %s1283_s19   ;;  %s1025_s18 = sphi %s1072_s18, %s1282_s18   ;;  %s1021_s17 = sphi %s1070_s17, %s1281_s17   ;;  %s1017_s16 = sphi %s1068_s16, %s1280_s16   ;;  %s1013_s15 = sphi %s1066_s15, %s1279_s15  }
   0x5   : > { %s29_s23 = sadd.s32 1, %s1029_s19  ;;  %s136_s24 = sadd.s32 1, %s1021_s17 }
   0x6   : > { %p31_p0 = scmp.ge.s32.totalorder %s29_s23, 3  ;;  %p146_p1 = scmp.ne.s32.totalorder %s1021_s17, %s1017_s16 }
   0x7   : > { %p147_p2 = scmp.eq.s32.totalorder %s787_s21, 2  ;;  %p152_p3 = scmp.ne.s32.totalorder %s1017_s16, %s1013_s15 }
   0x8   : > { %s1285_s23 = smov (%p31_p0, %s29_s23), 0  ;;  %p153_p5 = scmp.eq.s32.totalorder %s788_s22, 2 }
   0x9   : > { %p1106_p4 = por %p147_p2, %p146_p1  ;;  %s131_s26 = ssub.s32 %s1029_s19, %s1285_s23 }
   0xa   : > { %p791_p6 = scmp.ge.s32.totalorder %s1033_s20, 1  ;;  %p134_p7 = scmp.eq.s32.totalorder %s131_s26, 0 }
   0xb   : > { %p1113_p8 = por %p153_p5, %p152_p3  ;;  %p198_p9 = scmp.lt.s32.totalorder %s1033_s20, 4 }
   0xc   : > { %s1119_s28 = scalar_select %p134_p7, %s1021_s17, %s136_s24  }
   0xd   : > { %p199_p10 = pnand %p791_p6, %p198_p9 }
   0xe   : > { %s1035_s5 = smov (!%p199_p10), 126   ;;  %p234_p11 = scmp.lt.s32.totalorder (!%p199_p10), %s1025_s18, 2 }
   0xf   : > { %202 = sbr.rel (%p199_p10) target bundleno = 402 (0x192), region = 36  ;;  %s1038_s11 = smov (!%p199_p10), 127  }
  0x10   : > { %s231_s26 = sand.u32 (!%p199_p10), 1, %s1017_s16   ;;  %s797_s30 = sshll.u32 (!%p199_p10), %s1025_s18, 3 }
  0x11   : > { %s792_s29 = sshll.u32 (!%p199_p10), %s231_s26, 3  ;;  %s975_s21 = scalar_lea.hbm (!%p199_p10), %s1276_s4, 24 }
  0x12   : > { %s233_s8 = scalar_lea.vmem (!%p199_p10), [#allocation2], %s792_s29 }
  0x13   : > { %s695_s9 = sshll.u32 (!%p199_p10), %s233_s8, 4  ;;  %s696_s9 = int_to_ptr.vmem [resolvable:$true] %s695_s9 }
  0x14   : > { %v1124_v0 = vld [vmem:[%s1275_s3] sm:$0xff]  ;;  %s1129_s6 = scalar_select %p234_p11, %s1025_s18, 2  ;;  %v1036_v2 = vmov 1   ;;  %v1037_v3 = vmov 0   ;;  %vm530_vm10 = vcmask 654336   ;;  %vm679_vm11 = vcmask 130048  }
  0x15   : > { %v596_v1 = vmul.f32 0.5, %v1124_v0  ;;  %887 = vset.pattern.permute.xlu2 %v1036_v2  ;;  %886 = vset.pattern.permute.xlu1 %v1037_v3  ;;  %s682_s18 = scalar_lea.sflag [#allocation3], %s231_s26 }
  0x16   : > { %888 = vset.pattern.permute.xlu0 %v1037_v3  ;;  %s824_s7 = smul.u32 40, %s1129_s6  ;;  %s794_s14 = sshll.u32 %s1129_s6, 2 }
  0x17   : > { %598 = vrot.lane.b32.xlu0 %v596_v1, %s1035_s5  ;;  %s248_s24 = scalar_lea.vmem %s1273_s1, %s794_s14 }
  0x18   : > { %s1135_s10 = scalar_lea.vmem %s1272_s0, %s824_s7  ;;  %s693_s7 = scalar_lea.hbm %s1276_s4, %s797_s30 }
  0x19   : > { %v823_v4 = vld [vmem:[%s1135_s10 + $0x20] sm:$0xff]   ;;  %v1142_v12 = vld [vmem:[%s1135_s10 + $0x18] sm:$0xff]  }
  0x1a   : > { %v819_v5 = vunpack.c.h.bf16 %v823_v4  ;;  %v1138_v8 = vunpack.c.l.bf16 %v823_v4  ;;  %v1145_v14 = vunpack.c.h.bf16 %v1142_v12 }
  0x1c   : > { %v278_v6 = vand.u32 2147483647, %v819_v5  ;;  %v277_v10 = vand.u32 2147483647, %v1138_v8  ;;  %v276_v15 = vand.u32 2147483647, %v1145_v14 }
  0x1d   : > { %v368_v20 = vmax.f32 %v819_v5, 0.0  ;;  %vm398_vm0 = vcmp.ge.f32.partialorder %v819_v5, 0.0  ;;  %v348_v26 = vmin.f32 %v819_v5, 0.0  ;;  %v367_v31 = vmax.f32 %v1138_v8, 0.0 }
  0x1e   : > { %v288_v7 = vsub.f32 0.0, %v278_v6  ;;  %v287_v11 = vsub.f32 0.0, %v277_v10  ;;  %v286_v18 = vsub.f32 0.0, %v276_v15  ;;  %vm397_vm1 = vcmp.ge.f32.partialorder %v1138_v8, 0.0 }
  0x1f   : > { %v378_v27 = vsub.f32 0.0, %v368_v20  ;;  %v347_v38 = vmin.f32 %v1138_v8, 0.0  ;;  %v377_v42 = vsub.f32 0.0, %v367_v31  ;;  %v366_v47 = vmax.f32 %v1145_v14, 0.0 }
  0x20   : > { %v307_v9 = vmul.f32 1.442695, %v288_v7  ;;  %v305_v13 = vmul.f32 1.442695, %v287_v11  ;;  %v303_v19 = vmul.f32 1.442695, %v286_v18 }
  0x21   : > { %vm396_vm2 = vcmp.ge.f32.partialorder %v1145_v14, 0.0  ;;  %v346_v59 = vmin.f32 %v1145_v14, 0.0  ;;  %v376_v62 = vsub.f32 0.0, %v366_v47 }
  0x22   : > { %891 = vpow2.f32 %v307_v9 }
  0x23   : > { %893 = vpow2.f32 %v305_v13 }
  0x28   : > { %v892_v16 = vpop.eup %891 }
  0x29   : > { %v318_v17 = vadd.f32 1.0, %v892_v16  ;;  %v894_v21 = vpop.eup %893  ;;  %v408_v28 = vsel %vm398_vm0, 1.0, %v892_v16 }
  0x2a   : > { %v317_v23 = vadd.f32 1.0, %v894_v21  ;;  %v407_v43 = vsel %vm397_vm1, 1.0, %v894_v21 }
  0x2b   : > { %895 = vlog2.f32 %v318_v17 }
  0x2c   : > { %897 = vrcp.f32 %v318_v17 }
  0x2d   : > { %899 = vpow2.f32 %v303_v19 }
  0x2e   : > { %901 = vlog2.f32 %v317_v23 }
  0x2f   : > { %903 = vrcp.f32 %v317_v23 }
  0x31   : > { %v896_v29 = vpop.eup %895 }
  0x32   : > { %v898_v32 = vpop.eup %897  ;;  %v338_v33 = vmul.f32 0.6931472, %v896_v29 }
  0x33   : > { %v900_v34 = vpop.eup %899  ;;  %v428_v35 = vmul.f32 %v898_v32, %v408_v28 }
  0x34   : > { %v358_v36 = vsub.f32 %v348_v26, %v338_v33  ;;  %v388_v37 = vsub.f32 %v378_v27, %v338_v33  ;;  %v316_v39 = vadd.f32 1.0, %v900_v34  ;;  %v902_v44 = vpop.eup %901  ;;  %v406_v63 = vsel %vm396_vm2, 1.0, %v900_v34  ;;  %v821_v27 = vld [vmem:[%s1135_s10 + $0x10] sm:$0xff]   ;;  %v820_v34 = vld [vmem:[%s1135_s10 + $0x8] sm:$0xff]  }
  0x35   : > { %v438_v40 = vsub.f32 1.0, %v428_v35  ;;  %v488_v41 = vmul.f32 %v428_v35, %v428_v35  ;;  %v904_v48 = vpop.eup %903  ;;  %v336_v51 = vmul.f32 0.6931472, %v902_v44  ;;  %v1162_v26 = vunpack.c.l.bf16 %v1142_v12 }
  0x36   : > { %v468_v45 = vsub.f32 0.0, %v358_v36  ;;  %v508_v46 = vsub.f32 0.0, %v388_v37  ;;  %905 = vlog2.f32 %v316_v39  ;;  %v427_v52 = vmul.f32 %v904_v48, %v407_v43  ;;  %v801_v48 = vld [vmem:[%s1135_s10] sm:$0xff]   ;;  %s697_s10 = sshll.u32 %s693_s7, 4  ;;  %s698_s10 = int_to_ptr.hbm [resolvable:$true] %s697_s10 }
  0x37   : > { %v448_v49 = vmul.f32 %v438_v40, %v438_v40  ;;  %v498_v50 = vmul.f32 0.75, %v488_v41  ;;  %907 = vrcp.f32 %v316_v39  ;;  %v357_v55 = vsub.f32 %v347_v38, %v336_v51 }
  0x38   : > { %v387_v56 = vsub.f32 %v377_v42, %v336_v51  ;;  %v437_v57 = vsub.f32 1.0, %v427_v52  ;;  %v487_v58 = vmul.f32 %v427_v52, %v427_v52  ;;  %v275_v28 = vand.u32 2147483647, %v1162_v26 }
  0x39   : > { %v458_v53 = vmul.f32 0.25, %v448_v49  ;;  %v518_v54 = vmul.f32 %v508_v46, %v498_v50  ;;  %v467_v3 = vsub.f32 0.0, %v357_v55  ;;  %v1166_v29 = vunpack.c.h.bf16 %v821_v27 }
  0x3a   : > { %v507_v61 = vsub.f32 0.0, %v387_v56  ;;  %v447_v2 = vmul.f32 %v437_v57, %v437_v57  ;;  %v497_v4 = vmul.f32 0.75, %v487_v58  ;;  %v285_v31 = vsub.f32 0.0, %v275_v28 }
  0x3b   : > { %v478_v60 = vmul.f32 %v468_v45, %v458_v53  ;;  %v274_v32 = vand.u32 2147483647, %v1166_v29  ;;  %v1169_v33 = vunpack.c.l.bf16 %v821_v27  ;;  %v1173_v38 = vunpack.c.h.bf16 %v820_v34 }
  0x3c   : > { %v906_v1 = vpop.eup %905  ;;  %v457_v8 = vmul.f32 0.25, %v447_v2  ;;  %v517_v9 = vmul.f32 %v507_v61, %v497_v4  ;;  %v301_v35 = vmul.f32 1.442695, %v285_v31  ;;  %v1176_v41 = vunpack.c.l.bf16 %v820_v34 }
  0x3d   : > { %v908_v5 = vpop.eup %907  ;;  %v528_v6 = vsub.f32 %v478_v60, %v518_v54  ;;  %v334_v7 = vmul.f32 0.6931472, %v906_v1  ;;  %v284_v36 = vsub.f32 0.0, %v274_v32  ;;  %v273_v37 = vand.u32 2147483647, %v1169_v33 }
  0x3e   : > { %v426_v10 = vmul.f32 %v908_v5, %v406_v63  ;;  %v477_v15 = vmul.f32 %v467_v3, %v457_v8  ;;  %909 = vpow2.f32 %v301_v35  ;;  %v272_v40 = vand.u32 2147483647, %v1173_v38 }
  0x3f   : > { %540 = vmatpush.msra.mxu0 %v528_v6  ;;  %v356_v11 = vsub.f32 %v346_v59, %v334_v7  ;;  %v386_v13 = vsub.f32 %v376_v62, %v334_v7  ;;  %v299_v12 = vmul.f32 1.442695, %v284_v36  ;;  %v283_v39 = vsub.f32 0.0, %v273_v37 }
  0x40   : > { %v436_v14 = vsub.f32 1.0, %v426_v10  ;;  %v486_v16 = vmul.f32 %v426_v10, %v426_v10  ;;  %v527_v18 = vsub.f32 %v477_v15, %v517_v9  ;;  %v282_v43 = vsub.f32 0.0, %v272_v40 }
  0x41   : > { %v506_v17 = vsub.f32 0.0, %v386_v13  ;;  %v466_v20 = vsub.f32 0.0, %v356_v11  ;;  %911 = vpow2.f32 %v299_v12  ;;  %v297_v42 = vmul.f32 1.442695, %v283_v39 }
  0x42   : > { %v446_v19 = vmul.f32 %v436_v14, %v436_v14  ;;  %v496_v21 = vmul.f32 0.75, %v486_v16  ;;  %541 = vmatpush.msra.mxu0 %v527_v18  ;;  %v271_v44 = vand.u32 2147483647, %v1176_v41  ;;  %v295_v45 = vmul.f32 1.442695, %v282_v43 }
  0x43   : > { %913 = vpow2.f32 %v297_v42  ;;  %v1180_v53 = vunpack.c.h.bf16 %v801_v48  ;;  %v1184_v55 = vunpack.c.l.bf16 %v801_v48  ;;  %vm395_vm3 = vcmp.ge.f32.partialorder %v1162_v26, 0.0 }
  0x44   : > { %v516_v23 = vmul.f32 %v506_v17, %v496_v21  ;;  %v281_v46 = vsub.f32 0.0, %v271_v44  ;;  %v910_v47 = vpop.eup %909  ;;  %915 = vpow2.f32 %v295_v45  ;;  %v365_v1 = vmax.f32 %v1162_v26, 0.0 }
  0x45   : > { %v315_v49 = vadd.f32 1.0, %v910_v47  ;;  %v270_v58 = vand.u32 2147483647, %v1180_v53  ;;  %v405_v60 = vsel %vm395_vm3, 1.0, %v910_v47  ;;  %v269_v62 = vand.u32 2147483647, %v1184_v55 }
  0x46   : > { %v293_v50 = vmul.f32 1.442695, %v281_v46  ;;  %vm394_vm4 = vcmp.ge.f32.partialorder %v1166_v29, 0.0  ;;  %v345_v8 = vmin.f32 %v1162_v26, 0.0  ;;  %v375_v9 = vsub.f32 0.0, %v365_v1 }
  0x47   : > { %v912_v51 = vpop.eup %911  ;;  %917 = vrcp.f32 %v315_v49  ;;  %v1197_v5 = vsub.f32 0.0, %v270_v58  ;;  %v364_v13 = vmax.f32 %v1166_v29, 0.0  ;;  %v1201_v14 = vsub.f32 0.0, %v269_v62 }
  0x48   : > { %v314_v52 = vadd.f32 1.0, %v912_v51  ;;  %919 = vpow2.f32 %v293_v50  ;;  %v404_v4 = vsel %vm394_vm4, 1.0, %v912_v51  ;;  %vm393_vm5 = vcmp.ge.f32.partialorder %v1169_v33, 0.0 }
  0x49   : > { %v1182_v54 = vpop.eup %913  ;;  %921 = vlog2.f32 %v315_v49  ;;  %v343_v46 = vmin.f32 %v1169_v33, 0.0  ;;  %v363_v47 = vmax.f32 %v1169_v33, 0.0  ;;  %v362_v62 = vmax.f32 %v1173_v38, 0.0 }
  0x4a   : > { %v1186_v56 = vpop.eup %915  ;;  %923 = vrcp.f32 %v314_v52  ;;  %v313_v57 = vadd.f32 1.0, %v1182_v54  ;;  %v403_v50 = vsel %vm393_vm5, 1.0, %v1182_v54  ;;  %vm392_vm6 = vcmp.ge.f32.partialorder %v1173_v38, 0.0 }
  0x4b   : > { %925 = vlog2.f32 %v314_v52  ;;  %v312_v61 = vadd.f32 1.0, %v1186_v56  ;;  %v373_v58 = vsub.f32 0.0, %v363_v47  ;;  %v372_v54 = vsub.f32 0.0, %v362_v62 }
  0x4c   : > { %927 = vlog2.f32 %v313_v57  ;;  %vm391_vm7 = vcmp.ge.f32.partialorder %v1176_v41, 0.0  ;;  %vm390_vm8 = vcmp.ge.f32.partialorder %v1180_v53, 0.0  ;;  %vm389_vm9 = vcmp.ge.f32.partialorder %v1184_v55, 0.0 }
  0x4d   : > { %v918_v59 = vpop.eup %917  ;;  %929 = vlog2.f32 %v312_v61  ;;  %v339_v62 = vmin.f32 %v1184_v55, 0.0 }
  0x4e   : > { %v1193_v63 = vpop.eup %919  ;;  %v425_v2 = vmul.f32 %v918_v59, %v405_v60  ;;  %931 = vrcp.f32 %v313_v57 }
  0x4f   : > { %v922_v3 = vpop.eup %921  ;;  %933 = vrcp.f32 %v312_v61  ;;  %v311_v27 = vadd.f32 1.0, %v1193_v63  ;;  %v342_v61 = vmin.f32 %v1173_v38, 0.0 }
  0x50   : > { %v924_v6 = vpop.eup %923  ;;  %v332_v7 = vmul.f32 0.6931472, %v922_v3  ;;  %v435_v10 = vsub.f32 1.0, %v425_v2 }
  0x51   : > { %v926_v11 = vpop.eup %925  ;;  %v424_v15 = vmul.f32 %v924_v6, %v404_v4  ;;  %935 = vlog2.f32 %v311_v27 }
  0x52   : > { %v355_v16 = vsub.f32 %v345_v8, %v332_v7  ;;  %v385_v17 = vsub.f32 %v375_v9, %v332_v7  ;;  %v445_v18 = vmul.f32 %v435_v10, %v435_v10  ;;  %v330_v21 = vmul.f32 0.6931472, %v926_v11 }
  0x53   : > { %v434_v35 = vsub.f32 1.0, %v424_v15  ;;  %v484_v37 = vmul.f32 %v424_v15, %v424_v15  ;;  %v402_v7 = vsel %vm392_vm6, 1.0, %v1186_v56  ;;  %937 = vrcp.f32 %v311_v27 }
  0x54   : > { %v505_v26 = vsub.f32 0.0, %v385_v17 }
  0x55   : > { %v444_v42 = vmul.f32 %v434_v35, %v434_v35  ;;  %v494_v45 = vmul.f32 0.75, %v484_v37 }
  0x57   : > { %v454_v49 = vmul.f32 0.25, %v444_v42 }
  0x89   : > { %v599_v22 = vpop.permute.xlu0 %598 }
  0x8a   : > { %v601_v24 = vsub.f32 %v1124_v0, %v599_v22  ;;  %v602_v25 = vadd.f32 %v599_v22, %v1124_v0  ;;  %v456_v22 = vmul.f32 0.25, %v446_v19  ;;  %v928_v19 = vpop.eup %927 }
  0x8b   : > { %v930_v28 = vpop.eup %929  ;;  %v328_v12 = vmul.f32 0.6931472, %v928_v19 }
  0x8c   : > { %634 = vperm.xlu2 %887, %v602_v25   ;;  %619 = vperm.xlu1 %886, %v602_v25   ;;  %v1150_v30 = vsub.f32 %v602_v25, %v601_v24  ;;  %v932_v39 = vpop.eup %931  ;;  %v326_v51 = vmul.f32 0.6931472, %v930_v28 }
  0x8d   : > { %v934_v44 = vpop.eup %933  ;;  %v353_v57 = vsub.f32 %v343_v46, %v328_v12  ;;  %v423_v59 = vmul.f32 %v932_v39, %v403_v50  ;;  %v383_v1 = vsub.f32 %v373_v58, %v328_v12  ;;  %v340_v58 = vmin.f32 %v1180_v53, 0.0 }
  0x8e   : > { %611 = vrot.lane.b32.xlu0 %v1150_v30, %s1038_s11  ;;  %v352_v6 = vsub.f32 %v342_v61, %v326_v51  ;;  %v936_v8 = vpop.eup %935  ;;  %v382_v15 = vsub.f32 %v372_v54, %v326_v51  ;;  %s969_s11 = sshra.s32 %s698_s10, 4  ;;  %s970_s11 = int_to_ptr.hbm [resolvable:$true] %s969_s11 }
  0x8f   : > { %v433_v33 = vsub.f32 1.0, %v423_v59  ;;  %v483_v3 = vmul.f32 %v423_v59, %v423_v59  ;;  %v503_v11 = vsub.f32 0.0, %v383_v1  ;;  %v938_v12 = vpop.eup %937  ;;  %s971_s12 = scalar_lea.hbm %s970_s11, 8  ;;  %p976_p1 = scmp.lt.s32.totalorder %s970_s11, %s1276_s4 }
  0x90   : > { %p972_p12 = scmp.ne.s32.totalorder %s970_s11, %s971_s12  ;;  %p977_p2 = scmp.lt.s32.totalorder %s975_s21, %s971_s12 }
  0x91   : > { %v443_v9 = vmul.f32 %v433_v33, %v433_v33  ;;  %v493_v10 = vmul.f32 0.75, %v483_v3 }
  0x92   : > { %p973_p13 = pnand %p972_p12, %p1106_p4  ;;  %p978_p3 = por %p977_p2, %p976_p1 }
  0x93   : > { %v453_v17 = vmul.f32 0.25, %v443_v9  ;;  %v513_v38 = vmul.f32 %v503_v11, %v493_v10 }
  0x94   : > { %640 = vperm.xlu2 %887, %v601_v24   ;;  %626 = vperm.xlu1 %886, %v601_v24   ;;  %v476_v24 = vmul.f32 %v466_v20, %v456_v22  ;;  %v485_v20 = vmul.f32 %v425_v2, %v425_v2  ;;  %v344_v22 = vmin.f32 %v1166_v29, 0.0  ;;  %v463_v2 = vsub.f32 0.0, %v353_v57  ;;  %p974_p0 = pneg %p973_p13 }
  0x96   : > { %v526_v25 = vsub.f32 %v476_v24, %v516_v23  ;;  %v374_v23 = vsub.f32 0.0, %v364_v13  ;;  %v455_v24 = vmul.f32 0.25, %v445_v18  ;;  %v495_v31 = vmul.f32 0.75, %v485_v20  ;;  %p979_p5 = pnand %p978_p3, %p974_p0 }
  0x97   : > { %v354_v32 = vsub.f32 %v344_v22, %v330_v21  ;;  %v422_v13 = vmul.f32 %v934_v44, %v402_v7  ;;  %v502_v20 = vsub.f32 0.0, %v382_v15  ;;  %v289_v22 = vmul.f32 1.442695, %v1201_v14 }
  0x98   : > { %542 = vmatpush.msra.mxu0 %v526_v25  ;;  %v465_v25 = vsub.f32 0.0, %v355_v16  ;;  %v384_v34 = vsub.f32 %v374_v23, %v330_v21  ;;  %v515_v40 = vmul.f32 %v505_v26, %v495_v31  ;;  %v291_v16 = vmul.f32 1.442695, %v1197_v5 }
  0x99   : > { %v464_v29 = vsub.f32 0.0, %v354_v32  ;;  %v432_v18 = vsub.f32 1.0, %v422_v13  ;;  %v482_v19 = vmul.f32 %v422_v13, %v422_v13  ;;  %v361_v21 = vmax.f32 %v1176_v41, 0.0 }
  0x9a   : > { %v475_v36 = vmul.f32 %v465_v25, %v455_v24  ;;  %v504_v43 = vsub.f32 0.0, %v384_v34  ;;  %v473_v23 = vmul.f32 %v463_v2, %v453_v17  ;;  %v462_v24 = vsub.f32 0.0, %v352_v6 }
  0x9b   : > { %v474_v60 = vmul.f32 %v464_v29, %v454_v49  ;;  %v442_v56 = vmul.f32 %v432_v18, %v432_v18  ;;  %v492_v25 = vmul.f32 0.75, %v482_v19  ;;  %v324_v26 = vmul.f32 0.6931472, %v936_v8 }
  0x9c   : > { %560 = vperm.xlu1 %886, %v1124_v0   ;;  %567 = vperm.xlu2 %887, %v1124_v0   ;;  %v525_v48 = vsub.f32 %v475_v36, %v515_v40  ;;  %v514_v52 = vmul.f32 %v504_v43, %v494_v45  ;;  %v371_v28 = vsub.f32 0.0, %v361_v21  ;;  %v523_v31 = vsub.f32 %v473_v23, %v513_v38 }
  0x9d   : > { %v452_v5 = vmul.f32 0.25, %v442_v56  ;;  %v512_v32 = vmul.f32 %v502_v20, %v492_v25  ;;  %939 = vpow2.f32 %v291_v16  ;;  %v341_v34 = vmin.f32 %v1176_v41, 0.0 }
  0x9e   : > { %543 = vmatpush.msra.mxu0 %v525_v48  ;;  %v524_v4 = vsub.f32 %v474_v60, %v514_v52  ;;  %941 = vpow2.f32 %v289_v22  ;;  %v401_v14 = vsel %vm391_vm7, 1.0, %v1193_v63  ;;  %v381_v37 = vsub.f32 %v371_v28, %v324_v26 }
  0x9f   : > { %v472_v35 = vmul.f32 %v462_v24, %v452_v5  ;;  %v351_v39 = vsub.f32 %v341_v34, %v324_v26  ;;  %v1039_v40 = vmov 2   ;;  %v421_v27 = vmul.f32 %v938_v12, %v401_v14 }
  0xa0   : > { %544 = vmatpush.msra.mxu0 %v524_v4  ;;  %v501_v45 = vsub.f32 0.0, %v381_v37  ;;  %v360_v49 = vmax.f32 %v1180_v53, 0.0  ;;  %v359_v52 = vmax.f32 %v1184_v55, 0.0  ;;  %v1040_v14 = vmov 3  }
  0xa1   : > { %v522_v36 = vsub.f32 %v472_v35, %v512_v32  ;;  %v431_v44 = vsub.f32 1.0, %v421_v27  ;;  %v481_v41 = vmul.f32 %v421_v27, %v421_v27  ;;  %v461_v46 = vsub.f32 0.0, %v351_v39  ;;  %v529_v35 = vld [vmem:[%s1274_s2] sm:$0xff] }
  0xa2   : > { %545 = vmatpush.msra.mxu0 %v523_v31  ;;  %v370_v59 = vsub.f32 0.0, %v360_v49  ;;  %v369_v3 = vsub.f32 0.0, %v359_v52  ;;  %v554_v39 = vld [vmem:[%s248_s24] sm:$0xf] }
  0xa3   : > { %v940_v42 = vpop.eup %939  ;;  %v441_v63 = vmul.f32 %v431_v44, %v431_v44  ;;  %v491_v48 = vmul.f32 0.75, %v481_v41 }
  0xa4   : > { %889 = vset.pattern.permute.xlu1 %v1039_v40  ;;  %546 = vmatpush.msra.mxu0 %v522_v36  ;;  %v310_v29 = vadd.f32 1.0, %v940_v42  ;;  %v942_v43 = vpop.eup %941  ;;  %v400_v60 = vsel %vm390_vm8, 1.0, %v940_v42  ;;  %v555_v40 = vmax.f32 %v554_v39, 0.0001 }
  0xa5   : > { %575 = vperm.xlu1 %889, %v1124_v0   ;;  %v309_v47 = vadd.f32 1.0, %v942_v43  ;;  %v451_v50 = vmul.f32 0.25, %v441_v63  ;;  %v511_v51 = vmul.f32 %v501_v45, %v491_v48  ;;  %v399_v4 = vsel %vm389_vm9, 1.0, %v942_v43  ;;  %890 = vset.pattern.permute.xlu2 %v1040_v14 }
  0xa6   : > { %943 = vlog2.f32 %v310_v29  ;;  %583 = vperm.xlu2 %890, %v1124_v0   ;;  %v556_v42 = vmin.f32 %v555_v40, 0.9999 }
  0xa7   : > { %945 = vrcp.f32 %v310_v29  ;;  %v471_v57 = vmul.f32 %v461_v46, %v451_v50 }
  0xa8   : > { %947 = vlog2.f32 %v309_v47  ;;  %v590_v29 = vmul.f32 0.5, %v556_v42 }
  0xa9   : > { %949 = vrcp.f32 %v309_v47  ;;  %v521_v33 = vsub.f32 %v471_v57, %v511_v51 }
  0xaa   : > { %v592_v44 = vrot.slane %v590_v29, 2 }
  0xab   : > { %547 = vmatpush.msra.mxu0 %v521_v33 }
  0xac   : > { %v944_v61 = vpop.eup %943  ;;  %v595_v41 = vadd.f32 %v592_v44, %v556_v42  ;;  %v594_v45 = vsub.f32 %v556_v42, %v592_v44 }
  0xad   : > { %v946_v1 = vpop.eup %945  ;;  %v322_v2 = vmul.f32 0.6931472, %v944_v61 }
  0xae   : > { %v948_v6 = vpop.eup %947  ;;  %v420_v54 = vmul.f32 %v946_v1, %v400_v60  ;;  %v623_v46 = vperm.slane %v594_v45, 0  ;;  %v603_v47 = vsub.f32 %v595_v41, %v594_v45  ;;  %v638_v63 = vperm.slane %v594_v45, 1 }
  0xaf   : > { %v950_v7 = vpop.eup %949  ;;  %v350_v8 = vsub.f32 %v340_v58, %v322_v2  ;;  %v380_v9 = vsub.f32 %v370_v59, %v322_v2  ;;  %v320_v10 = vmul.f32 0.6931472, %v948_v6  ;;  %v616_v48 = vperm.slane %v595_v41, 0 }
  0xb0   : > { %v430_v11 = vsub.f32 1.0, %v420_v54  ;;  %v480_v13 = vmul.f32 %v420_v54, %v420_v54  ;;  %v419_v53 = vmul.f32 %v950_v7, %v399_v4  ;;  %v632_v49 = vperm.slane %v595_v41, 1 }
  0xb1   : > { %v460_v15 = vsub.f32 0.0, %v350_v8  ;;  %v500_v16 = vsub.f32 0.0, %v380_v9  ;;  %v349_v17 = vsub.f32 %v339_v62, %v320_v10  ;;  %v379_v38 = vsub.f32 %v369_v3, %v320_v10 }
  0xb2   : > { %v440_v55 = vmul.f32 %v430_v11, %v430_v11  ;;  %v490_v18 = vmul.f32 0.75, %v480_v13  ;;  %v429_v19 = vsub.f32 1.0, %v419_v53  ;;  %v479_v20 = vmul.f32 %v419_v53, %v419_v53 }
  0xb3   : > { %v459_v21 = vsub.f32 0.0, %v349_v17  ;;  %v499_v22 = vsub.f32 0.0, %v379_v38  ;;  %v605_v51 = vrot.slane %v603_v47, 1  ;;  %v563_v7 = vperm.slane %v556_v42, 0 }
  0xb4   : > { %v450_v23 = vmul.f32 0.25, %v440_v55  ;;  %v510_v56 = vmul.f32 %v500_v16, %v490_v18  ;;  %v439_v24 = vmul.f32 %v429_v19, %v429_v19  ;;  %v489_v25 = vmul.f32 0.75, %v479_v20 }
  0xb5   : > { %v607_v33 = vmul.f32 %v605_v51, %v603_v47  ;;  %v570_v8 = vperm.slane %v556_v42, 1  ;;  %v578_v17 = vperm.slane %v556_v42, 2 }
  0xb6   : > { %v470_v26 = vmul.f32 %v460_v15, %v450_v23  ;;  %v449_v28 = vmul.f32 0.25, %v439_v24  ;;  %v509_v31 = vmul.f32 %v499_v22, %v489_v25  ;;  %v586_v23 = vperm.slane %v556_v42, 3 }
  0xb7   : > { %v608_v10 = vmax.f32 %v607_v33, 0.0 }
  0xb8   : > { %v520_v5 = vsub.f32 %v470_v26, %v510_v56  ;;  %v469_v32 = vmul.f32 %v459_v21, %v449_v28 }
  0xb9   : > { %v648_v18 = vperm.slane %v608_v10, 0 }
  0xba   : > { %548 = vmatpush.msra.mxu0 %v520_v5  ;;  %v519_v34 = vsub.f32 %v469_v32, %v509_v31 }
  0xbc   : > { %549 = vmatpush.msra.mxu0 %v519_v34 }
  0xbd   : > { %795 = vmatmul.msk.f32.vlgmr.msra.gmra.mxu0 %vm530_vm10, %v529_v35 }
  0xe6   : > { %v635_v43 = vpop.permute.xlu2 %634 }
  0xe7   : > { %v637_v62 = vmin.f32 %v632_v49, %v635_v43  ;;  %v661_v2 = vmax.f32 %v632_v49, %v635_v43 }
  0xfe   : > { %v620_v27 = vpop.permute.xlu1 %619 }
  0xff   : > { %v622_v58 = vmin.f32 %v616_v48, %v620_v27  ;;  %v657_v61 = vmax.f32 %v616_v48, %v620_v27 }
 0x100   : > { %v612_v36 = vpop.permute.xlu0 %611 }
 0x101   : > { %v614_v37 = vmul.f32 %v612_v36, %v1150_v30  ;;  %v641_v30 = vpop.permute.xlu2 %640 }
 0x102   : > { %v643_v57 = vmax.f32 %v638_v63, %v641_v30  ;;  %v662_v60 = vmin.f32 %v638_v63, %v641_v30 }
 0x103   : > { %v615_v12 = vmax.f32 %v614_v37, 0.0 }
 0x104   : > { %v644_v4 = vsub.f32 %v637_v62, %v643_v57  ;;  %v663_v54 = vsub.f32 %v661_v2, %v662_v60 }
 0x105   : > { %651 = vperm.xlu0 %888, %v615_v12  }
 0x106   : > { %v627_v0 = vpop.permute.xlu1 %626  ;;  %v645_v13 = vmax.f32 %v644_v4, 0.0  ;;  %v664_v53 = vmax.f32 %v663_v54, 0.0 }
 0x107   : > { %v629_v50 = vmax.f32 %v623_v46, %v627_v0  ;;  %v658_v52 = vmin.f32 %v623_v46, %v627_v0 }
 0x109   : > { %v630_v1 = vsub.f32 %v622_v58, %v629_v50  ;;  %v659_v3 = vsub.f32 %v657_v61, %v658_v52  ;;  %v568_v6 = vpop.permute.xlu2 %567 }
 0x10a   : > { %v571_v16 = vsub.f32 %v568_v6, %v570_v8 }
 0x10b   : > { %v631_v9 = vmax.f32 %v630_v1, 0.0  ;;  %v660_v11 = vmax.f32 %v659_v3, 0.0 }
 0x10c   : > { %v572_v21 = vand.u32 2147483647, %v571_v16 }
 0x10d   : > { %v646_v55 = vmul.f32 %v645_v13, %v631_v9  ;;  %v665_v19 = vmul.f32 %v664_v53, %v660_v11 }
 0x10e   : > { %v561_v59 = vpop.permute.xlu1 %560 }
 0x10f   : > { %v564_v15 = vsub.f32 %v561_v59, %v563_v7  ;;  %v647_v25 = vmax.f32 %v646_v55, 0.0  ;;  %v666_v28 = vmax.f32 %v665_v19, 0.0001 }
 0x111   : > { %v565_v20 = vand.u32 2147483647, %v564_v15  ;;  %v584_v24 = vpop.permute.xlu2 %583  ;;  %951 = vrcp.f32 %v666_v28 }
 0x112   : > { %v587_v34 = vsub.f32 %v584_v24, %v586_v23 }
 0x113   : > { %v573_v5 = vadd.f32 %v572_v21, %v565_v20 }
 0x114   : > { %v588_v36 = vand.u32 2147483647, %v587_v34 }
 0x117   : > { %v576_v38 = vpop.permute.xlu1 %575  ;;  %v952_v12 = vpop.eup %951 }
 0x118   : > { %v579_v22 = vsub.f32 %v576_v38, %v578_v17 }
 0x11a   : > { %v580_v32 = vand.u32 2147483647, %v579_v22 }
 0x11c   : > { %v581_v14 = vadd.f32 %v580_v32, %v573_v5 }
 0x11e   : > { %v589_v39 = vadd.f32 %v588_v36, %v581_v14 }
 0x120   : > { %v674_v43 = vmul.f32 5.0, %v589_v39 }
 0x13a   : > { %v551_v42 = vpop.f32.mrf.mxu0 }
 0x13b   : > { %v673_v44 = vmul.f32 2.0, %v551_v42 }
 0x13d   : > { %v675_v0 = vadd.f32 %v674_v43, %v673_v44 }
 0x177   : > { %v652_v56 = vpop.permute.xlu0 %651 }
 0x178   : > { %v654_v26 = vadd.f32 %v652_v56, %v648_v18 }
 0x17a   : > { %v655_v31 = vsub.f32 %v654_v26, %v647_v25 }
 0x17c   : > { %v656_v35 = vmax.f32 %v655_v31, 0.0001 }
 0x17e   : > { %953 = vrcp.f32 %v656_v35  ;;  %v669_v37 = vsub.f32 %v666_v28, %v656_v35 }
 0x180   : > { %v671_v29 = vmul.f32 %v952_v12, %v669_v37 }
 0x184   : > { %v954_v40 = vpop.eup %953 }
 0x185   : > { %v668_v27 = vmul.f32 %v954_v40, %v647_v25 }
 0x187   : > { %v672_v41 = vsub.f32 %v668_v27, %v671_v29 }
 0x189   : > { %v676_v45 = vsub.f32 0.0, %v672_v41 }
 0x18b   : > { %v677_v46 = vmul.f32 2.0, %v676_v45 }
 0x18d   : > { %v678_v47 = vadd.f32 %v677_v46, %v675_v0 }
 0x18f   : > { %680 = vst.msk [vmem:[%s233_s8] sm:$0xff] %vm679_vm11, %v678_v47 }
 0x190   : > { %982 = shalt.err (!%p979_p5)
}
 0x191   : > { %825 = dma.vmem_to_hbm [thread:$0]  (%p1106_p4), %s696_s9, 128, %s698_s10, %s682_s18  }
 0x192 PF: > { %p831_p6 = scmp.ge.s32.totalorder %s1033_s20, 2  ;;  %s709_s26 = sand.u32 1, %s1013_s15  }
 0x193   : > { %s710_s29 = scalar_lea.sflag [#allocation3], %s709_s26 }
 0x194   : > { %p828_p7 = pnand %p831_p6, %p1113_p8 }
 0x196   : > { %p829_p9 = pneg %p828_p7 }
 0x198   : > { %1008 = dma.done.wait (%p829_p9), %s710_s29, 128  }
 0x199   : > { %1010 = vsyncadd (%p829_p9), %s710_s29, 4294967168  ;;  %s17_s20 = sadd.s32 1, %s1033_s20   ;;  %s1279_s15 = smov %s1017_s16 }
 0x19a   : > { %p14_p10 = scmp.ge.s32.totalorder %s17_s20, 5   ;;  %s1280_s16 = smov %s1021_s17 }
 0x19b   : > { %s1281_s17 = smov %s1119_s28  ;;  %s1282_s18 = smov %s1029_s19 }
 0x19c   : > { %s1283_s19 = smov %s1285_s23  ;;  %16 = sbr.rel (!%p14_p10) target bundleno = 4 (0x4), region = 74 }
 0x1a1   :  { %716 = vsyncpa [#allocation3], 1 }
 0x1a2   :  { %718 = vsyncpa [#allocation3 + $0x1], 1 }

</bundles_post_ra>
